<compile_context>
chip_gen: v5e
topology: v5e:2x2
jax: 0.10.0
libtpu: 0.0.40
codegen_flags: <defaults>
</compile_context>

<pallas_src>
import jax
import jax.numpy as jnp
from jax.experimental import pallas as pl
from jax.experimental.pallas import tpu as pltpu

# ----------------------------- sizes (small, synthetic) ----------------------
B = 2        # batch
S = 8        # sequence length (encoder and decoder)
H = 32       # BERT_TOKEN_EMBEDDING_SIZE stand-in
E = 16       # emb_dim (LinearHead output)
V = 128      # vocab size stand-in
EP = 128     # lane-padded LinearHead width (E -> 128)
CLS_ID = 1   # decoder_start_token_id stand-in

POOLING_METHOD_AVG = "avg"


# ----------------------------- fused Pallas kernel ----------------------------
def make_fused_kernel(batch, seq, ep, vocab, emb_rows):
    """One invocation, grid=(): big projection dot + pooling dot + L2 normalize."""
    two_b = 2 * batch
    bs = batch * seq

    def kernel(enc_ref, dec_ref, pmat_ref, w_ref, b_ref, out_ref):
        # enc_ref / dec_ref: (B*S, H)   encoder / decoder last hidden states
        # pmat_ref:          (2B, 2B*S) block-diagonal mask/seq_len pooling matrix
        # w_ref:             (H, 2*EP + V)  [W_enc_pad | W_dec_pad | W_lm]
        # b_ref:             (1, 2*EP + V)  [b_enc_pad | b_dec_pad | b_lm]
        # out_ref:           (emb_rows + B*S, 128) output slab

        hidden = jnp.concatenate([enc_ref[...], dec_ref[...]], axis=0)      # (2B*S, H)

        # --- single MXU pass: head projections + LM head, bias folded per-token
        y = jnp.dot(hidden, w_ref[...],
                    preferred_element_type=jnp.float32) + b_ref[...]        # (2B*S, 2EP+V)

        # --- decoder LM-head logits: decoder rows, last V lanes (bias included)
        logits = y[bs:, 2 * ep:]                                            # (B*S, V)

        # --- masked average pooling on the MXU; pmat rows sum to 1, so
        #     pmat @ (h@W + b) == (pmat@h)@W + b  (bias survives pooling)
        pooled = jnp.dot(pmat_ref[...], y[:, :2 * ep],
                         preferred_element_type=jnp.float32)                # (2B, 2EP)

        # rows [0,B): encoder head lanes [0,EP); rows [B,2B): decoder head lanes [EP,2EP)
        rid = jax.lax.broadcasted_iota(jnp.int32, (two_b, 1), 0)
        emb = jnp.where(rid < batch, pooled[:, :ep], pooled[:, ep:])        # (2B, EP)

        # padded lanes of W/b are zero -> contribute 0 to the norm
        sumsq = jnp.sum(emb * emb, axis=1, keepdims=True)
        emb = emb * jax.lax.rsqrt(jnp.maximum(sumsq, 1e-24))  # = x / max(||x||, 1e-12)

        # --- one lane-dense, sublane-aligned output slab, single unmasked store
        parts = [emb]
        if emb_rows > two_b:
            parts.append(jnp.zeros((emb_rows - two_b, ep), jnp.float32))
        parts.append(logits)
        out_ref[...] = jnp.concatenate(parts, axis=0)

    return kernel


def build_head_slabs(W_enc, b_enc, W_dec, b_dec, W_lm, b_lm, ep=EP):
    """Hoisted (init-time) construction of the fused weight/bias slabs."""
    hid, emb_dim = W_enc.shape
    vocab = W_lm.shape[1]
    f32 = jnp.float32

    def pad_w(w):
        return jnp.zeros((hid, ep), f32).at[:, :emb_dim].set(w.astype(f32))

    def pad_b(b):
        return jnp.zeros((1, ep), f32).at[:, :emb_dim].set(b.astype(f32).reshape(1, emb_dim))

    W_big = jnp.concatenate([pad_w(W_enc), pad_w(W_dec), W_lm.astype(f32)], axis=1)
    b_big = jnp.concatenate([pad_b(b_enc), pad_b(b_dec),
                             b_lm.astype(f32).reshape(1, vocab)], axis=1)
    return W_big, b_big   # (H, 2*EP+V), (1, 2*EP+V)


def build_pool_matrix(attention_mask, gen_attention_mask):
    """Block-diagonal pooling matrix pmat[r, r*S + s] = mask[r, s] / seq_len[r]."""
    mask_all = jnp.concatenate([attention_mask, gen_attention_mask],
                               axis=0).astype(jnp.float32)                  # (2B, S)
    seq_len = jnp.sum(mask_all, axis=1, keepdims=True)                      # (2B, 1)
    # NOTE: an all-zero mask row yields NaN here, matching the torch/JAX reference.
    wmask = mask_all / seq_len
    two_b, seq = mask_all.shape
    eye = jnp.eye(two_b, dtype=jnp.float32)
    return (eye[:, :, None] * wmask[None, :, :]).reshape(two_b, two_b * seq)


def fused_heads(enc_hidden, dec_hidden, attention_mask, gen_attention_mask,
                W_big, b_big, emb_dim):
    """One pallas_call producing (encoder_emb, decoder_emb, decoder_logits)."""
    batch, seq, hid = enc_hidden.shape
    two_b = 2 * batch
    ep = EP
    vocab = W_big.shape[1] - 2 * ep
    assert vocab == ep == 128, "single-slab output layout assumes V == padded head width == 128"
    emb_rows = ((two_b + 7) // 8) * 8          # pad emb rows to a sublane multiple
    out_rows = emb_rows + batch * seq

    # reshape of contiguous [B,S,H] -> [B*S,H] is free (no HBM copy)
    enc_flat = enc_hidden.reshape(batch * seq, hid)
    dec_flat = dec_hidden.reshape(batch * seq, hid)
    pmat = build_pool_matrix(attention_mask, gen_attention_mask)            # (2B, 2B*S)

    vmem = pl.BlockSpec(memory_space=pltpu.MemorySpace.VMEM)
    flops = (2 * (two_b * seq) * hid * (2 * ep + vocab)     # big projection dot
             + 2 * two_b * (two_b * seq) * (2 * ep))        # pooling dot
    bytes_accessed = 4 * (enc_flat.size + dec_flat.size + pmat.size
                          + W_big.size + b_big.size + out_rows * 128)

    out = pl.pallas_call(
        make_fused_kernel(batch, seq, ep, vocab, emb_rows),
        out_shape=jax.ShapeDtypeStruct((out_rows, 128), jnp.float32),
        in_specs=[vmem] * 5,
        out_specs=vmem,
        cost_estimate=pl.CostEstimate(flops=flops, transcendentals=two_b,
                                      bytes_accessed=bytes_accessed),
    )(enc_flat, dec_flat, pmat, W_big, b_big)

    enc_emb = out[:batch, :emb_dim]
    dec_emb = out[batch:two_b, :emb_dim]
    logits = out[emb_rows:, :vocab].reshape(batch, seq, vocab)
    return enc_emb, dec_emb, logits


# ----------------------------- synthetic model --------------------------------
def init_params(key):
    ks = jax.random.split(key, 12)
    p = {
        # synthetic stand-in for the pretrained BERT encoder/decoder embeddings
        "word_emb_enc": jax.random.normal(ks[0], (V, H), jnp.float32) * 0.02,
        "type_emb_enc": jax.random.normal(ks[1], (2, H), jnp.float32) * 0.02,
        "pos_emb_enc":  jax.random.normal(ks[2], (S, H), jnp.float32) * 0.02,
        "word_emb_dec": jax.random.normal(ks[3], (V, H), jnp.float32) * 0.02,
        "pos_emb_dec":  jax.random.normal(ks[4], (S, H), jnp.float32) * 0.02,
        # decoder LM head (logits over vocab)
        "W_lm": jax.random.normal(ks[5], (H, V), jnp.float32) * 0.05,
        "b_lm": jax.random.normal(ks[6], (V,), jnp.float32) * 0.01,
        # LinearHead(BERT_TOKEN_EMBEDDING_SIZE, emb_dim) x2
        "W_enc_head": jax.random.normal(ks[7], (H, E), jnp.float32) * 0.05,
        "b_enc_head": jax.random.normal(ks[8], (E,), jnp.float32) * 0.01,
        "W_dec_head": jax.random.normal(ks[9], (H, E), jnp.float32) * 0.05,
        "b_dec_head": jax.random.normal(ks[10], (E,), jnp.float32) * 0.01,
    }
    # fused weight/bias slabs built once here (hoisted out of the forward path)
    p["W_big"], p["b_big"] = build_head_slabs(
        p["W_enc_head"], p["b_enc_head"], p["W_dec_head"], p["b_dec_head"],
        p["W_lm"], p["b_lm"])
    return p


def synthetic_encoder(params, input_ids, token_type_ids):
    # TODO(synk): real module uses a pretrained BERT encoder; replaced here with a
    # deterministic embedding-sum stand-in producing last_hidden_state [B, S, H].
    h = (params["word_emb_enc"][input_ids]
         + params["type_emb_enc"][token_type_ids]
         + params["pos_emb_enc"][None, :, :])
    return jnp.tanh(h)


def synthetic_decoder(params, gen_label_input_ids, enc_hidden, attention_mask):
    # TODO(synk): real module uses a pretrained BERT decoder with cross-attention;
    # replaced with shifted-label embeddings + broadcast encoder context.
    start = jnp.full((gen_label_input_ids.shape[0], 1), CLS_ID, gen_label_input_ids.dtype)
    dec_input_ids = jnp.concatenate([start, gen_label_input_ids[:, :-1]], axis=1)
    m = attention_mask.astype(jnp.float32)[:, :, None]
    ctx = jnp.sum(enc_hidden * m, axis=1, keepdims=True) / jnp.sum(m, axis=1, keepdims=True)
    h = (params["word_emb_dec"][dec_input_ids]
         + params["pos_emb_dec"][None, :, :]
         + ctx)
    return jnp.tanh(h)


def sentence_sim_seq2seq_forward(params, input_ids, attention_mask, token_type_ids,
                                 gen_label_input_ids, gen_attention_mask):
    # encoder branch
    enc_hidden = synthetic_encoder(params, input_ids, token_type_ids)            # [B,S,H]
    # seq2seq / decoder branch (gen_label_input_ids & gen_attention_mask given)
    dec_hidden = synthetic_decoder(params, gen_label_input_ids, enc_hidden,
                                   attention_mask)                               # [B,S,H]
    # one fused Pallas call: pooled heads (enc + dec) and LM-head logits
    return fused_heads(enc_hidden, dec_hidden, attention_mask, gen_attention_mask,
                       params["W_big"], params["b_big"], E)


# ----------------------------- reference (pure JAX) ---------------------------
def _ref_pooled_head(hidden, mask, W, b):
    m = mask.astype(jnp.float32)[:, :, None]
    pooled = jnp.sum(hidden * m, axis=1) / jnp.sum(m, axis=1)
    out = pooled @ W + b
    norm = jnp.sqrt(jnp.sum(out * out, axis=1, keepdims=True))
    return out / jnp.maximum(norm, 1e-12)


if __name__ == "__main__":
    key = jax.random.PRNGKey(0)
    kp, k1, k2, k3, k4 = jax.random.split(key, 5)
    params = init_params(kp)

    input_ids = jax.random.randint(k1, (B, S), 0, V, dtype=jnp.int32)
    token_type_ids = jnp.zeros((B, S), jnp.int32)
    attention_mask = jnp.array([[1, 1, 1, 1, 1, 1, 0, 0],
                                [1, 1, 1, 1, 1, 1, 1, 1]], jnp.int32)
    gen_label_input_ids = jax.random.randint(k2, (B, S), 0, V, dtype=jnp.int32)
    gen_attention_mask = jnp.array([[1, 1, 1, 1, 0, 0, 0, 0],
                                    [1, 1, 1, 1, 1, 1, 1, 0]], jnp.int32)

    enc_emb, dec_emb, dec_logits = jax.block_until_ready(
        sentence_sim_seq2seq_forward(params, input_ids, attention_mask,
                                     token_type_ids, gen_label_input_ids,
                                     gen_attention_mask))

    # quick correctness check against a pure-JAX reference
    enc_hidden = synthetic_encoder(params, input_ids, token_type_ids)
    dec_hidden = synthetic_decoder(params, gen_label_input_ids, enc_hidden, attention_mask)
    ref_enc = _ref_pooled_head(enc_hidden, attention_mask,
                               params["W_enc_head"], params["b_enc_head"])
    ref_dec = _ref_pooled_head(dec_hidden, gen_attention_mask,
                               params["W_dec_head"], params["b_dec_head"])
    ref_logits = dec_hidden.reshape(B * S, H) @ params["W_lm"] + params["b_lm"]
    ref_logits = ref_logits.reshape(B, S, V)

    # tolerances account for MXU f32 rounding and the (pmat@h)@W -> pmat@(h@W) reorder
    assert jnp.allclose(enc_emb, ref_enc, atol=1e-4, rtol=1e-4), "encoder_emb mismatch"
    assert jnp.allclose(dec_emb, ref_dec, atol=1e-4, rtol=1e-4), "decoder_emb mismatch"
    assert jnp.allclose(dec_logits, ref_logits, atol=1e-4, rtol=1e-4), "decoder_logits mismatch"
    assert enc_emb.shape == (B, E) and dec_emb.shape == (B, E) and dec_logits.shape == (B, S, V)

    print("KERNEL_OK")
</pallas_src>

<mosaic_0001>
module attributes {stable_mosaic.version = 11 : i64} {
  func.func @kernel(%arg0: memref<16x32xf32, #tpu.memory_space<vmem>>, %arg1: memref<16x32xf32, #tpu.memory_space<vmem>>, %arg2: memref<4x32xf32, #tpu.memory_space<vmem>>, %arg3: memref<32x384xf32, #tpu.memory_space<vmem>>, %arg4: memref<1x384xf32, #tpu.memory_space<vmem>>, %arg5: memref<24x128xf32, #tpu.memory_space<vmem>>) attributes {dimension_semantics = [], scalar_prefetch = 0 : i64, scratch_operands = 0 : i64, tpu.core_type = #tpu.core_type<tc>} {
    %c0 = arith.constant 0 : index
    %c0_0 = arith.constant 0 : index
    %0 = vector.load %arg0[%c0, %c0_0] : memref<16x32xf32, #tpu.memory_space<vmem>>, vector<16x32xf32>
    %c0_1 = arith.constant 0 : index
    %c0_2 = arith.constant 0 : index
    %1 = vector.load %arg1[%c0_1, %c0_2] : memref<16x32xf32, #tpu.memory_space<vmem>>, vector<16x32xf32>
    %2 = tpu.concatenate %0, %1 in 0 : vector<16x32xf32>, vector<16x32xf32> -> vector<32x32xf32>
    %c0_3 = arith.constant 0 : index
    %c0_4 = arith.constant 0 : index
    %3 = vector.load %arg3[%c0_3, %c0_4] : memref<32x384xf32, #tpu.memory_space<vmem>>, vector<32x384xf32>
    %cst = arith.constant dense<0.000000e+00> : vector<32x384xf32>
    %4 = tpu.matmul %2, %3, %cst {dimension_numbers = #tpu.dot_dimension_numbers<[1], [0], [0], [1], [0, 0, 1, 1], [], []>} : vector<32x32xf32>, vector<32x384xf32>, vector<32x384xf32> -> vector<32x384xf32>
    %c0_5 = arith.constant 0 : index
    %c0_6 = arith.constant 0 : index
    %5 = vector.load %arg4[%c0_5, %c0_6] : memref<1x384xf32, #tpu.memory_space<vmem>>, vector<1x384xf32>
    %6 = vector.broadcast %5 : vector<1x384xf32> to vector<32x384xf32>
    %7 = arith.addf %4, %6 : vector<32x384xf32>
    %8 = vector.extract_strided_slice %7 {offsets = [16, 256], sizes = [16, 128], strides = [1, 1]} : vector<32x384xf32> to vector<16x128xf32>
    %c0_7 = arith.constant 0 : index
    %c0_8 = arith.constant 0 : index
    %9 = vector.load %arg2[%c0_7, %c0_8] : memref<4x32xf32, #tpu.memory_space<vmem>>, vector<4x32xf32>
    %10 = vector.extract_strided_slice %7 {offsets = [0, 0], sizes = [32, 256], strides = [1, 1]} : vector<32x384xf32> to vector<32x256xf32>
    %cst_9 = arith.constant dense<0.000000e+00> : vector<4x256xf32>
    %11 = tpu.matmul %9, %10, %cst_9 {dimension_numbers = #tpu.dot_dimension_numbers<[1], [0], [0], [1], [0, 0, 1, 1], [], []>} : vector<4x32xf32>, vector<32x256xf32>, vector<4x256xf32> -> vector<4x256xf32>
    %12 = tpu.iota {dimensions = array<i32: 0>} : vector<4x1xi32>
    %c2_i32 = arith.constant 2 : i32
    %13 = vector.broadcast %c2_i32 : i32 to vector<4x1xi32>
    %14 = arith.cmpi slt, %12, %13 : vector<4x1xi32>
    %15 = vector.extract_strided_slice %11 {offsets = [0, 0], sizes = [4, 128], strides = [1, 1]} : vector<4x256xf32> to vector<4x128xf32>
    %16 = vector.extract_strided_slice %11 {offsets = [0, 128], sizes = [4, 128], strides = [1, 1]} : vector<4x256xf32> to vector<4x128xf32>
    %17 = vector.shape_cast %14 : vector<4x1xi1> to vector<4x1xi1>
    %18 = vector.broadcast %17 : vector<4x1xi1> to vector<4x128xi1>
    %19 = arith.select %18, %15, %16 : vector<4x128xi1>, vector<4x128xf32>
    %20 = arith.mulf %19, %19 : vector<4x128xf32>
    %cst_10 = arith.constant dense<0.000000e+00> : vector<4xf32>
    %21 = vector.multi_reduction <add>, %20, %cst_10 [1] : vector<4x128xf32> to vector<4xf32>
    %22 = vector.shape_cast %21 : vector<4xf32> to vector<4x1xf32>
    %cst_11 = arith.constant 1.000000e-24 : f32
    %23 = vector.broadcast %cst_11 : f32 to vector<4x1xf32>
    %24 = arith.maximumf %22, %23 : vector<4x1xf32>
    %25 = math.rsqrt %24 : vector<4x1xf32>
    %26 = vector.broadcast %25 : vector<4x1xf32> to vector<4x128xf32>
    %27 = arith.mulf %19, %26 : vector<4x128xf32>
    %cst_12 = arith.constant 0.000000e+00 : f32
    %28 = vector.broadcast %cst_12 : f32 to vector<4x128xf32>
    %29 = tpu.concatenate %27, %28, %8 in 0 : vector<4x128xf32>, vector<4x128xf32>, vector<16x128xf32> -> vector<24x128xf32>
    %c0_13 = arith.constant 0 : index
    %c0_14 = arith.constant 0 : index
    %30 = vector.load %arg5[%c0_13, %c0_14] : memref<24x128xf32, #tpu.memory_space<vmem>>, vector<24x128xf32>
    tpu.vector_store %arg5[%c0_13, %c0_14], %29 {strides = array<i32>} : memref<24x128xf32, #tpu.memory_space<vmem>>, vector<24x128xf32>,
    return
  }
}

</mosaic_0001>

<bundles_post_ra>
// kernel: tpu_custom_call.1
= control target key start
LH: loop header
LB: loop body
LE: loop exit
PB: predicated region body
PF: predicated region fallthrough
CT: control target
= control target key end

     0   :  { %10 = vsyncpa [#allocation3], 0  ;;  %s531_s0 = inlined_call_operand.hbm [shape: f32[16,32], index: 0, kind: input, shape index: {}]   ;;  %s532_s1 = inlined_call_operand.hbm [shape: f32[16,32], index: 1, kind: input, shape index: {}]   ;;  %s533_s2 = inlined_call_operand.hbm [shape: f32[4,32], index: 2, kind: input, shape index: {}]   ;;  %s534_s3 = inlined_call_operand.hbm [shape: f32[32,384], index: 3, kind: input, shape index: {}]   ;;  %s535_s4 = inlined_call_operand.vmem [shape: f32[1,384], index: 4, kind: input, shape index: {}]   ;;  %s536_s5 = inlined_call_operand.hbm [shape: f32[24,128], index: 5, kind: output, shape index: {}]  }
   0x1   :  { %11 = vsyncpa [#allocation6], 0 }
   0x2   :  { %12 = vsyncpa [#allocation9], 0 }
   0x3   :  { %13 = vsyncpa [#allocation4], 0  ;;  %s31_s20 = sshll.u32 %s532_s1, 4  ;;  %s449_s21 = smov [#allocation5]   ;;  %s32_s20 = int_to_ptr.hbm [resolvable:$true] %s31_s20 }
   0x4   :  { %s33_s22 = sshll.u32 %s449_s21, 4  ;;  %s18_s25 = sshll.u32 %s531_s0, 4  ;;  %s34_s22 = int_to_ptr.vmem [resolvable:$true] %s33_s22  ;;  %s19_s25 = int_to_ptr.hbm [resolvable:$true] %s18_s25 }
   0x5   :  { %s450_s26 = smov 128   ;;  %s451_s27 = smov 8  }
   0x6   :  { %39 = dma.hbm_to_vmem [thread:$0]  %s32_s20, 256, %s34_s22, [#allocation6], %s450_s26, %s450_s26, %s451_s27  }
   0x7   :  { %s452_s28 = smov [#allocation2]   ;;  %s45_s1 = sshll.u32 %s533_s2, 4  ;;  %s46_s1 = int_to_ptr.hbm [resolvable:$true] %s45_s1 }
   0x8   :  { %s20_s29 = sshll.u32 %s452_s28, 4  ;;  %s55_s8 = sshll.u32 %s534_s3, 4  ;;  %s21_s29 = int_to_ptr.vmem [resolvable:$true] %s20_s29  ;;  %s56_s8 = int_to_ptr.hbm [resolvable:$true] %s55_s8 }
   0x9   :  { %26 = dma.hbm_to_vmem [thread:$0]  %s19_s25, 256, %s21_s29, [#allocation3], %s450_s26, %s450_s26, %s451_s27  }
   0xa   :  { %s453_s9 = smov [#allocation7]   ;;  %s454_s11 = smov [#allocation8]  }
   0xb   :  { %s47_s10 = sshll.u32 %s453_s9, 4  ;;  %s57_s12 = sshll.u32 %s454_s11, 4  ;;  %s48_s10 = int_to_ptr.vmem [resolvable:$true] %s47_s10  ;;  %s58_s12 = int_to_ptr.vmem [resolvable:$true] %s57_s12 }
   0xc   :  { %50 = dma.hbm_to_vmem [thread:$0]  %s46_s1, 64, %s48_s10, [#allocation6]  }
   0xd   :  { %s455_s13 = smov 384   ;;  %s456_s2 = smov 24  }
   0xe   :  { %63 = dma.hbm_to_vmem [thread:$0]  %s56_s8, 1536, %s58_s12, [#allocation9], %s455_s13, %s455_s13, %s456_s2  }
   0xf   :  { %441 = dma.done.wait [#allocation3], 256  }
  0x10   :  { %442 = vsyncadd [#allocation3], 4294967040 }
  0x11   :  { %443 = dma.done.wait [#allocation6], 320  }
  0x12   :  { %444 = vsyncadd [#allocation6], 4294966976 }
  0x13   :  { %445 = dma.done.wait [#allocation9], 1536  }
  0x14   :  { %446 = vsyncadd [#allocation9], 4294965760  ;;  %v95_v0 = vld [vmem:[#allocation8 + $0x48] sm:$0xff]  ;;  %v92_v1 = vld [vmem:[#allocation8 + $0x30] sm:$0xff]  ;;  %vm106_vm0 = vcmask 261120   ;;  %v248_v38 = vlaneseq  ;;  %vm255_vm2 = vcmask 1043456  }
  0x15   :  { %131 = vmatpush.msra.mxu0 %v95_v0  ;;  %v96_v2 = vld [vmem:[#allocation8 + $0x50] sm:$0xff]  ;;  %v89_v3 = vld [vmem:[#allocation8 + $0x18] sm:$0xff]  ;;  %v90_v5 = vld [vmem:[#allocation8 + $0x20] sm:$0xff]  ;;  %s281_s18 = sshll.u32 %s536_s5, 4  ;;  %s282_s18 = int_to_ptr.hbm [resolvable:$true] %s281_s18 }
  0x16   :  { %160 = vmatpush.msra.mxu1 %v96_v2  ;;  %v93_v4 = vld [vmem:[#allocation8 + $0x38] sm:$0xff]  ;;  %v86_v6 = vld [vmem:[#allocation8] sm:$0xff]  ;;  %v87_v8 = vld [vmem:[#allocation8 + $0x8] sm:$0xff]  ;;  %v249_v40 = vshrl.u32 %v248_v38, 7 }
  0x17   :  { %132 = vmatpush.msra.mxu0 %v92_v1  ;;  %v82_v7 = vld [vmem:[#allocation2] sm:$0xff]  ;;  %v83_v9 = vld [vmem:[#allocation2 + $0x8] sm:$0xff]  ;;  %v84_v10 = vld [vmem:[#allocation5] sm:$0xff] }
  0x18   :  { %161 = vmatpush.msra.mxu1 %v93_v4  ;;  %v85_v11 = vld [vmem:[#allocation5 + $0x8] sm:$0xff]  ;;  %v94_v17 = vld [vmem:[#allocation8 + $0x40] sm:$0xff]  ;;  %v91_v18 = vld [vmem:[#allocation8 + $0x28] sm:$0xff]  ;;  %vm250_vm1 = vcmp.lt.s32.totalorder %v249_v40, 2 }
  0x19   :  { %133 = vmatpush.msra.mxu0 %v89_v3  ;;  %v97_v16 = vld [vmem:[#allocation8 + $0x58] sm:$0xff]  ;;  %v88_v19 = vld [vmem:[#allocation8 + $0x10] sm:$0xff] }
  0x1a   :  { %162 = vmatpush.msra.mxu1 %v90_v5  ;;  %189 = vmatpush.msra.mxu2 %v97_v16  ;;  %v98_v22 = vld [vmem:[%s535_s4] sm:$0x7]  ;;  %s457_s4 = smov [#allocation10]  }
  0x1b   :  { %134 = vmatpush.msra.mxu0 %v86_v6  ;;  %v100_v23 = vperm.slane %v98_v22, 0  ;;  %v101_v28 = vperm.slane %v98_v22, 1  ;;  %v204_v32 = vld [vmem:[#allocation7] sm:$0xf]  ;;  %v102_v45 = vperm.slane %v98_v22, 2  ;;  %s279_s15 = sshll.u32 %s457_s4, 4  ;;  %s280_s15 = int_to_ptr.vmem [resolvable:$true] %s279_s15 }
  0x1c   :  { %296 = vmatmul.msk.f32.vlgmr.msra.gmra.mxu0 %vm106_vm0, %v82_v7  ;;  %163 = vmatpush.msra.mxu1 %v87_v8 }
  0x1d   :  { %300 = vmatmul.msk.f32.vlgmr.msra.gmra.mxu1 %vm106_vm0, %v82_v7  ;;  %190 = vmatpush.msra.mxu2 %v94_v17 }
  0x1f   :  { %191 = vmatpush.msra.mxu2 %v91_v18 }
  0x21   :  { %192 = vmatpush.msra.mxu2 %v88_v19 }
  0x22   :  { %304 = vmatmul.msk.f32.vlgmr.msra.gmra.mxu2 %vm106_vm0, %v82_v7 }
  0x24   :  { %297 = vmatmul.msk.f32.gmra.mxu0 %vm106_vm0, %v83_v9 }
  0x25   :  { %301 = vmatmul.msk.f32.gmra.mxu1 %vm106_vm0, %v83_v9 }
  0x2a   :  { %305 = vmatmul.msk.f32.gmra.mxu2 %vm106_vm0, %v83_v9 }
  0x2c   :  { %298 = vmatmul.msk.f32.gmra.mxu0 %vm106_vm0, %v84_v10 }
  0x2d   :  { %302 = vmatmul.msk.f32.gmra.mxu1 %vm106_vm0, %v84_v10 }
  0x32   :  { %306 = vmatmul.msk.f32.gmra.mxu2 %vm106_vm0, %v84_v10 }
  0x34   :  { %299 = vmatmul.msk.f32.gmra.mxu0 %vm106_vm0, %v85_v11 }
  0x35   :  { %303 = vmatmul.msk.f32.gmra.mxu1 %vm106_vm0, %v85_v11 }
  0x3a   :  { %307 = vmatmul.msk.f32.gmra.mxu2 %vm106_vm0, %v85_v11 }
  0x99   :  { %v136_v12 = vpop.f32.mrf.mxu0 }
  0x9a   :  { %v165_v13 = vpop.f32.mrf.mxu1  ;;  %v137_v30 = vadd.f32 %v136_v12, %v100_v23 }
  0x9b   :  { %v166_v35 = vadd.f32 %v165_v13, %v101_v28 }
  0xa1   :  { %v139_v14 = vpop.f32.mrf.mxu0 }
  0xa2   :  { %v168_v15 = vpop.f32.mrf.mxu1  ;;  %v140_v29 = vadd.f32 %v139_v14, %v100_v23 }
  0xa3   :  { %v169_v34 = vadd.f32 %v168_v15, %v101_v28 }
  0xa5   :  { %v194_v36 = vpop.f32.mrf.mxu2 }
  0xa9   :  { %v142_v20 = vpop.f32.mrf.mxu0 }
  0xaa   :  { %v171_v21 = vpop.f32.mrf.mxu1  ;;  %v143_v26 = vadd.f32 %v142_v20, %v100_v23 }
  0xab   :  { %v172_v33 = vadd.f32 %v171_v21, %v101_v28 }
  0xad   :  { %v196_v37 = vpop.f32.mrf.mxu2 }
  0xb1   :  { %v145_v24 = vpop.f32.mrf.mxu0 }
  0xb2   :  { %v146_v25 = vadd.f32 %v145_v24, %v100_v23  ;;  %v174_v27 = vpop.f32.mrf.mxu1 }
  0xb3   :  { %v175_v31 = vadd.f32 %v174_v27, %v101_v28 }
  0xb4   :  { %220 = vmatpush.msra.mxu3 %v146_v25 }
  0xb5   :  { %v198_v46 = vpop.f32.mrf.mxu2 }
  0xb6   :  { %221 = vmatpush.msra.mxu3 %v143_v26  ;;  %v199_v47 = vadd.f32 %v198_v46, %v102_v45 }
  0xb8   :  { %222 = vmatpush.msra.mxu3 %v140_v29  ;;  %273 = vst [vmem:[#allocation10 + $0x8] sm:$0xff] %v199_v47 }
  0xba   :  { %223 = vmatpush.msra.mxu3 %v137_v30 }
  0xbb   :  { %308 = vmatmul.msk.f32.vlgmr.msra.gmra.mxu3 %vm106_vm0, %v204_v32 }
  0xbc   :  { %240 = vmatpush.msrb.mxu3 %v175_v31 }
  0xbd   :  { %v201_v48 = vpop.f32.mrf.mxu2 }
  0xbe   :  { %241 = vmatpush.msrb.mxu3 %v172_v33  ;;  %v202_v49 = vadd.f32 %v201_v48, %v102_v45 }
  0xc0   :  { %242 = vmatpush.msrb.mxu3 %v169_v34  ;;  %274 = vst [vmem:[#allocation10 + $0x10] sm:$0xff] %v202_v49 }
  0xc2   :  { %243 = vmatpush.msrb.mxu3 %v166_v35 }
  0xc3   :  { %309 = vmatmul.msk.f32.vlgmr.msrb.gmra.mxu3 %vm106_vm0, %v204_v32 }
 0x13e   :  { %v225_v39 = vpop.f32.mrf.mxu3 }
 0x146   :  { %v245_v41 = vpop.f32.mrf.mxu3 }
 0x147   :  { %v253_v42 = vsel %vm250_vm1, %v225_v39, %v245_v41 }
 0x148   :  { %v254_v43 = vmul.f32 %v253_v42, %v253_v42 }
 0x14a   :  { %v256_v44 = vsel %vm255_vm2, %v254_v43, 0.0 }
 0x14b   :  { %257 = vadd.xlane.f32.xlu0 %v256_v44 }
 0x1be   :  { %v258_v50 = vpop.xlane.xlu0 %257 }
 0x1bf   :  { %v259_v51 = vmax.f32 %v258_v50, 1e-24 }
 0x1c1   :  { %319 = vrsqrt.f32 %v259_v51  ;;  %vm266_vm4 = vweird.f32 %v259_v51 }
 0x1c7   :  { %v320_v52 = vpop.eup %319 }
 0x1c8   :  { %v261_v53 = vmul.f32 %v320_v52, %v259_v51  ;;  %vm267_vm3 = vweird.f32 %v320_v52 }
 0x1c9   :  { %vm268_vm5 = vmor %vm266_vm4, %vm267_vm3 }
 0x1ca   :  { %v262_v54 = vmul.f32 %v320_v52, %v261_v53 }
 0x1cc   :  { %v263_v55 = vmul.f32 0.5, %v262_v54 }
 0x1ce   :  { %v264_v56 = vsub.f32 1.5, %v263_v55 }
 0x1d0   :  { %v265_v57 = vmul.f32 %v320_v52, %v264_v56 }
 0x1d2   :  { %v269_v58 = vsel %vm268_vm5, %v320_v52, %v265_v57 }
 0x1d3   :  { %v270_v59 = vmul.f32 %v269_v58, %v253_v42 }
 0x1d5   :  { %v271_v60 = vsel %vm255_vm2, %v270_v59, 0.0 }
 0x1d6   :  { %272 = vst [vmem:[#allocation10] sm:$0xff] %v271_v60 }
 0x1d7   :  { %287 = dma.vmem_to_hbm [thread:$0]  %s280_s15, 384, %s282_s18, [#allocation4], %s450_s26, %s450_s26, %s451_s27  }
 0x1d8   :  { %447 = dma.done.wait [#allocation4], 384  }
 0x1d9   :  { %448 = vsyncadd [#allocation4], 4294966912 }
 0x1da   :  { %292 = vsyncpa [#allocation3], 1 }
 0x1db   :  { %293 = vsyncpa [#allocation6], 1 }
 0x1dc   :  { %294 = vsyncpa [#allocation9], 1 }
 0x1dd   :  { %295 = vsyncpa [#allocation4], 1 }

</bundles_post_ra>
